<compile_context>
chip_gen: v7x
topology: tpu7x:2x2x1
jax: 0.10.0
libtpu: 0.0.40
codegen_flags: <defaults>
</compile_context>

<pallas_src>
import math

import jax
import jax.numpy as jnp
from jax.experimental import pallas as pl
from jax.experimental.pallas import tpu as pltpu


def _dsconv_kernel(wd_ref, wp_ref, x_ref, o_ref):
    # wd_ref: (nin, K)            depthwise taps, f32
    # wp_ref: (nout, nin)         pointwise weights, f32
    # x_ref : (1, nin, TH, Wp)    input tile, native dtype (Wp = W + 2*pad)
    # o_ref : (1, nout, TH, Wo)   output tile, native dtype
    x = x_ref[0]                     # (nin, TH, Wp)
    wd = wd_ref[...]                 # (nin, K)
    wp = wp_ref[...]                 # (nout, nin)

    K = wd.shape[1]
    nin = x.shape[0]
    Wo = o_ref.shape[3]

    # Depthwise stage: per-channel K-tap FIR along W.  Static lane slices of the
    # already-loaded tile (no extra HBM traffic); f32 accumulation via promotion
    # by the f32 tap weights -- no explicit cast of the streamed slab.
    dw = x[:, :, 0:Wo] * wd[:, 0:1][:, :, None]               # (nin, TH, Wo) f32
    for k in range(1, K):
        dw = dw + x[:, :, k:k + Wo] * wd[:, k:k + 1][:, :, None]

    # Pointwise 1x1 stage: contraction over the tiny nin axis, unrolled as VPU
    # FMAs (nin is ~4; an MXU matmul here would be pure fill/drain and the op is
    # HBM-bound anyway).
    out = dw[0:1] * wp[:, 0:1][:, :, None]                    # (nout, TH, Wo) f32
    for c in range(1, nin):
        out = out + dw[c:c + 1] * wp[:, c:c + 1][:, :, None]

    o_ref[0] = out.astype(o_ref.dtype)


def deepwise_separable_conv(x, w_depth, w_point, kernel_size):
    """x: (N, nin, H, W) NCHW.  w_depth: (nin, K).  w_point: (nout, nin)."""
    N, nin, H, W = x.shape
    K = kernel_size
    pad = K // 2
    Wp = W + 2 * pad
    Wo = Wp - K + 1                   # == W for odd K (matches PyTorch "same")
    nout = w_point.shape[0]

    # Cheap halo pad along W only (2*pad extra columns) -- NOT a K-x im2col.
    x_pad = jnp.pad(x, ((0, 0), (0, 0), (0, 0), (pad, pad)))

    # Sublane-aligned H tile when possible; otherwise take the full H extent.
    TH = 8 if (H % 8 == 0) else H
    grid = (N, H // TH)

    out = pl.pallas_call(
        _dsconv_kernel,
        out_shape=jax.ShapeDtypeStruct((N, nout, H, Wo), x.dtype),
        grid=grid,
        in_specs=[
            pl.BlockSpec((nin, K), lambda n, h: (0, 0)),        # resident
            pl.BlockSpec((nout, nin), lambda n, h: (0, 0)),     # resident
            pl.BlockSpec((1, nin, TH, Wp), lambda n, h: (n, 0, h, 0)),
        ],
        out_specs=pl.BlockSpec((1, nout, TH, Wo), lambda n, h: (n, 0, h, 0)),
        compiler_params=pltpu.CompilerParams(
            dimension_semantics=("parallel", "parallel")),
    )(w_depth.astype(jnp.float32), w_point.astype(jnp.float32), x_pad)

    return out


def _reference(x, w_depth, w_point, kernel_size):
    """Pure-JAX reference matching PyTorch Conv2d semantics (cross-correlation)."""
    N, nin, H, W = x.shape
    K = kernel_size
    pad = K // 2
    x_pad = jnp.pad(x, ((0, 0), (0, 0), (0, 0), (pad, pad)))
    Wo = W + 2 * pad - K + 1
    dw = jnp.zeros((N, nin, H, Wo), jnp.float32)
    for k in range(K):
        dw = dw + x_pad[:, :, :, k:k + Wo].astype(jnp.float32) * w_depth[None, :, k, None, None]
    return jnp.einsum("oc,nchw->nohw", w_point, dw)


if __name__ == "__main__":
    # Small shapes consistent with the module: N=2, nin=4, nout=8, H=16, W=16, K=5.
    N, nin, nout, H, W, K = 2, 4, 8, 16, 16, 5

    key = jax.random.PRNGKey(0)
    kx, kd, kp = jax.random.split(key, 3)

    x = jax.random.normal(kx, (N, nin, H, W), dtype=jnp.float32)
    # Deterministic parameter init (shapes from nn.Conv2d; kaiming-ish scale).
    w_depth = jax.random.normal(kd, (nin, K), dtype=jnp.float32) / math.sqrt(K)
    w_point = jax.random.normal(kp, (nout, nin), dtype=jnp.float32) / math.sqrt(nin)

    out = deepwise_separable_conv(x, w_depth, w_point, K)
    out = jax.block_until_ready(out)

    ref = _reference(x, w_depth, w_point, K)
    assert out.shape == (N, nout, H, W), out.shape
    assert jnp.allclose(out, ref, atol=1e-4, rtol=1e-4), "mismatch vs reference"

    print("KERNEL_OK")
</pallas_src>

<mosaic_0001>
module attributes {stable_mosaic.version = 11 : i64} {
  func.func @_dsconv_kernel(%arg0: i32, %arg1: i32, %arg2: memref<4x5xf32, #tpu.memory_space<vmem>>, %arg3: memref<8x4xf32, #tpu.memory_space<vmem>>, %arg4: memref<1x4x8x20xf32, #tpu.memory_space<vmem>>, %arg5: memref<1x8x8x16xf32, #tpu.memory_space<vmem>>) attributes {dimension_semantics = [#tpu.dimension_semantics<parallel>, #tpu.dimension_semantics<parallel>], iteration_bounds = array<i64: 2, 2>, scalar_prefetch = 0 : i64, scratch_operands = 0 : i64, tpu.core_type = #tpu.core_type<tc>, window_params = [{pipeline_mode = #tpu.pipeline_mode<synchronous>, transform_indices = @transform_0, window_bounds = array<i64: 4, 5>}, {pipeline_mode = #tpu.pipeline_mode<synchronous>, transform_indices = @transform_1, window_bounds = array<i64: 8, 4>}, {transform_indices = @transform_2, window_bounds = array<i64: 1, 4, 8, 20>}, {transform_indices = @transform_3, window_bounds = array<i64: 1, 8, 8, 16>}]} {
    %c0 = arith.constant 0 : index
    %c0_0 = arith.constant 0 : index
    %c0_1 = arith.constant 0 : index
    %c0_2 = arith.constant 0 : index
    %0 = vector.load %arg4[%c0, %c0_0, %c0_1, %c0_2] : memref<1x4x8x20xf32, #tpu.memory_space<vmem>>, vector<1x4x8x20xf32>
    %1 = vector.shape_cast %0 : vector<1x4x8x20xf32> to vector<4x8x20xf32>
    %c0_3 = arith.constant 0 : index
    %c0_4 = arith.constant 0 : index
    %2 = vector.load %arg2[%c0_3, %c0_4] : memref<4x5xf32, #tpu.memory_space<vmem>>, vector<4x5xf32>
    %c0_5 = arith.constant 0 : index
    %c0_6 = arith.constant 0 : index
    %3 = vector.load %arg3[%c0_5, %c0_6] : memref<8x4xf32, #tpu.memory_space<vmem>>, vector<8x4xf32>
    %4 = vector.extract_strided_slice %1 {offsets = [0, 0, 0], sizes = [4, 8, 16], strides = [1, 1, 1]} : vector<4x8x20xf32> to vector<4x8x16xf32>
    %5 = vector.extract_strided_slice %2 {offsets = [0, 0], sizes = [4, 1], strides = [1, 1]} : vector<4x5xf32> to vector<4x1xf32>
    %6 = vector.shape_cast %5 : vector<4x1xf32> to vector<4x1x1xf32>
    %7 = vector.broadcast %6 : vector<4x1x1xf32> to vector<4x8x16xf32>
    %8 = arith.mulf %4, %7 : vector<4x8x16xf32>
    %9 = vector.extract_strided_slice %1 {offsets = [0, 0, 1], sizes = [4, 8, 16], strides = [1, 1, 1]} : vector<4x8x20xf32> to vector<4x8x16xf32>
    %10 = vector.extract_strided_slice %2 {offsets = [0, 1], sizes = [4, 1], strides = [1, 1]} : vector<4x5xf32> to vector<4x1xf32>
    %11 = vector.shape_cast %10 : vector<4x1xf32> to vector<4x1x1xf32>
    %12 = vector.broadcast %11 : vector<4x1x1xf32> to vector<4x8x16xf32>
    %13 = arith.mulf %9, %12 : vector<4x8x16xf32>
    %14 = arith.addf %8, %13 : vector<4x8x16xf32>
    %15 = vector.extract_strided_slice %1 {offsets = [0, 0, 2], sizes = [4, 8, 16], strides = [1, 1, 1]} : vector<4x8x20xf32> to vector<4x8x16xf32>
    %16 = vector.extract_strided_slice %2 {offsets = [0, 2], sizes = [4, 1], strides = [1, 1]} : vector<4x5xf32> to vector<4x1xf32>
    %17 = vector.shape_cast %16 : vector<4x1xf32> to vector<4x1x1xf32>
    %18 = vector.broadcast %17 : vector<4x1x1xf32> to vector<4x8x16xf32>
    %19 = arith.mulf %15, %18 : vector<4x8x16xf32>
    %20 = arith.addf %14, %19 : vector<4x8x16xf32>
    %21 = vector.extract_strided_slice %1 {offsets = [0, 0, 3], sizes = [4, 8, 16], strides = [1, 1, 1]} : vector<4x8x20xf32> to vector<4x8x16xf32>
    %22 = vector.extract_strided_slice %2 {offsets = [0, 3], sizes = [4, 1], strides = [1, 1]} : vector<4x5xf32> to vector<4x1xf32>
    %23 = vector.shape_cast %22 : vector<4x1xf32> to vector<4x1x1xf32>
    %24 = vector.broadcast %23 : vector<4x1x1xf32> to vector<4x8x16xf32>
    %25 = arith.mulf %21, %24 : vector<4x8x16xf32>
    %26 = arith.addf %20, %25 : vector<4x8x16xf32>
    %27 = vector.extract_strided_slice %1 {offsets = [0, 0, 4], sizes = [4, 8, 16], strides = [1, 1, 1]} : vector<4x8x20xf32> to vector<4x8x16xf32>
    %28 = vector.extract_strided_slice %2 {offsets = [0, 4], sizes = [4, 1], strides = [1, 1]} : vector<4x5xf32> to vector<4x1xf32>
    %29 = vector.shape_cast %28 : vector<4x1xf32> to vector<4x1x1xf32>
    %30 = vector.broadcast %29 : vector<4x1x1xf32> to vector<4x8x16xf32>
    %31 = arith.mulf %27, %30 : vector<4x8x16xf32>
    %32 = arith.addf %26, %31 : vector<4x8x16xf32>
    %33 = vector.extract_strided_slice %32 {offsets = [0, 0, 0], sizes = [1, 8, 16], strides = [1, 1, 1]} : vector<4x8x16xf32> to vector<1x8x16xf32>
    %34 = vector.extract_strided_slice %3 {offsets = [0, 0], sizes = [8, 1], strides = [1, 1]} : vector<8x4xf32> to vector<8x1xf32>
    %35 = vector.shape_cast %34 : vector<8x1xf32> to vector<8x1x1xf32>
    %36 = vector.broadcast %33 : vector<1x8x16xf32> to vector<8x8x16xf32>
    %37 = vector.broadcast %35 : vector<8x1x1xf32> to vector<8x8x16xf32>
    %38 = arith.mulf %36, %37 : vector<8x8x16xf32>
    %39 = vector.extract_strided_slice %32 {offsets = [1, 0, 0], sizes = [1, 8, 16], strides = [1, 1, 1]} : vector<4x8x16xf32> to vector<1x8x16xf32>
    %40 = vector.extract_strided_slice %3 {offsets = [0, 1], sizes = [8, 1], strides = [1, 1]} : vector<8x4xf32> to vector<8x1xf32>
    %41 = vector.shape_cast %40 : vector<8x1xf32> to vector<8x1x1xf32>
    %42 = vector.broadcast %39 : vector<1x8x16xf32> to vector<8x8x16xf32>
    %43 = vector.broadcast %41 : vector<8x1x1xf32> to vector<8x8x16xf32>
    %44 = arith.mulf %42, %43 : vector<8x8x16xf32>
    %45 = arith.addf %38, %44 : vector<8x8x16xf32>
    %46 = vector.extract_strided_slice %32 {offsets = [2, 0, 0], sizes = [1, 8, 16], strides = [1, 1, 1]} : vector<4x8x16xf32> to vector<1x8x16xf32>
    %47 = vector.extract_strided_slice %3 {offsets = [0, 2], sizes = [8, 1], strides = [1, 1]} : vector<8x4xf32> to vector<8x1xf32>
    %48 = vector.shape_cast %47 : vector<8x1xf32> to vector<8x1x1xf32>
    %49 = vector.broadcast %46 : vector<1x8x16xf32> to vector<8x8x16xf32>
    %50 = vector.broadcast %48 : vector<8x1x1xf32> to vector<8x8x16xf32>
    %51 = arith.mulf %49, %50 : vector<8x8x16xf32>
    %52 = arith.addf %45, %51 : vector<8x8x16xf32>
    %53 = vector.extract_strided_slice %32 {offsets = [3, 0, 0], sizes = [1, 8, 16], strides = [1, 1, 1]} : vector<4x8x16xf32> to vector<1x8x16xf32>
    %54 = vector.extract_strided_slice %3 {offsets = [0, 3], sizes = [8, 1], strides = [1, 1]} : vector<8x4xf32> to vector<8x1xf32>
    %55 = vector.shape_cast %54 : vector<8x1xf32> to vector<8x1x1xf32>
    %56 = vector.broadcast %53 : vector<1x8x16xf32> to vector<8x8x16xf32>
    %57 = vector.broadcast %55 : vector<8x1x1xf32> to vector<8x8x16xf32>
    %58 = arith.mulf %56, %57 : vector<8x8x16xf32>
    %59 = arith.addf %52, %58 : vector<8x8x16xf32>
    %c0_7 = arith.constant 0 : index
    %c0_8 = arith.constant 0 : index
    %c0_9 = arith.constant 0 : index
    %c0_10 = arith.constant 0 : index
    %60 = vector.load %arg5[%c0_7, %c0_8, %c0_9, %c0_10] : memref<1x8x8x16xf32, #tpu.memory_space<vmem>>, vector<1x8x8x16xf32>
    %61 = vector.shape_cast %60 : vector<1x8x8x16xf32> to vector<8x8x16xf32>
    %62 = vector.shape_cast %59 : vector<8x8x16xf32> to vector<1x8x8x16xf32>
    tpu.vector_store %arg5[%c0_7, %c0_8, %c0_9, %c0_10], %62 {strides = array<i32>} : memref<1x8x8x16xf32, #tpu.memory_space<vmem>>, vector<1x8x8x16xf32>,
    return
  }
  func.func @transform_0(%arg0: i32, %arg1: i32) -> (i32, i32) {
    %c0_i32 = arith.constant 0 : i32
    %c0_i32_0 = arith.constant 0 : i32
    %c0_i32_1 = arith.constant 0 : i32
    return %c0_i32, %c0_i32_0 : i32, i32
  }
  func.func @transform_1(%arg0: i32, %arg1: i32) -> (i32, i32) {
    %c0_i32 = arith.constant 0 : i32
    %c0_i32_0 = arith.constant 0 : i32
    %c0_i32_1 = arith.constant 0 : i32
    return %c0_i32, %c0_i32_0 : i32, i32
  }
  func.func @transform_2(%arg0: i32, %arg1: i32) -> (i32, i32, i32, i32) {
    %c0_i32 = arith.constant 0 : i32
    %c0_i32_0 = arith.constant 0 : i32
    %c0_i32_1 = arith.constant 0 : i32
    return %arg0, %c0_i32, %arg1, %c0_i32_0 : i32, i32, i32, i32
  }
  func.func @transform_3(%arg0: i32, %arg1: i32) -> (i32, i32, i32, i32) {
    %c0_i32 = arith.constant 0 : i32
    %c0_i32_0 = arith.constant 0 : i32
    %c0_i32_1 = arith.constant 0 : i32
    return %arg0, %c0_i32, %arg1, %c0_i32_0 : i32, i32, i32, i32
  }
}

</mosaic_0001>

<bundles_post_ra>
// kernel: tpu_custom_call.1
= control target key start
LH: loop header
LB: loop body
LE: loop exit
PB: predicated region body
PF: predicated region fallthrough
CT: control target
= control target key end

     0   :  { %8 = vsyncpa [#allocation3], 0  ;;  %s1437_s0 = inlined_call_operand.vmem [shape: f32[4,5], index: 0, kind: input, shape index: {}]   ;;  %s1438_s1 = inlined_call_operand.vmem [shape: f32[8,4], index: 1, kind: input, shape index: {}]   ;;  %s1439_s2 = inlined_call_operand.hbm [shape: f32[2,4,16,20], index: 2, kind: input, shape index: {}]   ;;  %s1440_s3 = inlined_call_operand.hbm [shape: f32[2,8,16,16], index: 3, kind: output, shape index: {}]  }
   0x1   :  { %10 = vsyncpa [#allocation3 + $0x1], 0 }
   0x2   :  { %11 = vsyncpa [#allocation4], 0 }
   0x3   :  { %13 = vsyncpa [#allocation4 + $0x1], 0  ;;  %s1108_s12 = smov 0   ;;  %s1110_s13 = smov 0  }
   0x4   :  { %s1112_s14 = smov 0   ;;  %s1114_s15 = smov 0  }
   0x5   :  { %s1116_s16 = smov 0   ;;  %s1118_s17 = smov 0  }
   0x6   :  { %s1120_s18 = smov 0   ;;  %s1122_s19 = smov 0  }
   0x7 LB: > { %s811_s20 = sadd.s32 4294967295, %s1068_s19   ;;  %s812_s21 = sadd.s32 4294967294, %s1068_s19   ;;  %s1068_s19 = sphi %s1122_s19, %s19_s19   ;;  %s1064_s18 = sphi %s1120_s18, %s1458_s18   ;;  %s1060_s17 = sphi %s1118_s17, %s1457_s17   ;;  %s1056_s16 = sphi %s1116_s16, %s1456_s16   ;;  %s1052_s15 = sphi %s1114_s15, %s1455_s15   ;;  %s1048_s14 = sphi %s1112_s14, %s1454_s14   ;;  %s1044_s13 = sphi %s1110_s13, %s1453_s13   ;;  %s1040_s12 = sphi %s1108_s12, %s1452_s12  }
   0x8   : > { %s28_s22 = sadd.s32 1, %s1060_s17  ;;  %s31_s23 = sadd.s32 1, %s1064_s18 }
   0x9   : > { %p29_p0 = scmp.ge.s32.totalorder %s28_s22, 2  ;;  %s82_s24 = sadd.s32 1, %s1048_s14 }
   0xa   : > { %p89_p1 = scmp.ne.s32.totalorder %s1048_s14, %s1044_s13  ;;  %p90_p2 = scmp.eq.s32.totalorder %s1068_s19, 0 }
   0xb   : > { %s1460_s22 = smov (%p29_p0, %s28_s22), 0  ;;  %s1462_s23 = smov (!%p29_p0, %s31_s23), %s1064_s18 }
   0xc   : > { %s78_s25 = ssub.s32 %s1060_s17, %s1460_s22  ;;  %p1161_p3 = por %p90_p2, %p89_p1 }
   0xd   : > { %p33_p4 = scmp.ge.s32.totalorder %s1462_s23, 2  ;;  %p95_p5 = scmp.ne.s32.totalorder %s1044_s13, %s1040_s12 }
   0xe   : > { %p96_p6 = scmp.eq.s32.totalorder %s811_s20, 0  ;;  %p121_p7 = scmp.eq.s32.totalorder %s811_s20, 3 }
   0xf   : > { %s1464_s23 = smov (%p33_p4, %s1462_s23), 0  ;;  %p127_p10 = scmp.eq.s32.totalorder %s812_s21, 3 }
  0x10   : > { %1444 = sst [smem:[#allocation8_spill]] %s1464_s23  ;;  %p1169_p8 = por %p96_p6, %p95_p5 }
  0x11   : > { %p1173_p9 = por %p121_p7, %p89_p1  ;;  %s77_s29 = ssub.s32 %s1064_s18, %s1464_s23 }
  0x12   : > { %s79_s30 = sor.u32 %s78_s25, %s77_s29  ;;  %p1179_p12 = por %p127_p10, %p95_p5 }
  0x13   : > { %s1446_s28 = scalar_select %p1173_p9, 1, 0 }
  0x14   : > { %p80_p11 = scmp.eq.s32.totalorder %s79_s30, 0  ;;  %p839_p13 = scmp.lt.s32.totalorder %s1068_s19, 4 }
  0x15   : > { %s1447_s4 = scalar_select %p1179_p12, 1, 0 }
  0x16   : > { %s153_s5 = sand.u32 1, %s1048_s14   ;;  %s816_s8 = sshll.u32 %s1064_s18, 3 }
  0x17   : > { %s1186_s6 = scalar_select %p80_p11, %s1048_s14, %s82_s24  }
  0x18   : > { %s815_s7 = sshll.u32 %s153_s5, 5  ;;  %s162_s9 = sadd.s32 %s1060_s17, %s816_s8 }
  0x19   : > { %s157_s10 = scalar_lea.vmem [#allocation2], %s815_s7  ;;  %s817_s20 = sshll.u32 %s162_s9, 7 }
  0x1a   : > { %s165_s11 = sshll.u32 %s157_s10, 4  ;;  %s1195_s25 = scalar_lea.hbm %s1439_s2, %s817_s20  ;;  %s1190_s11 = int_to_ptr.vmem [resolvable:$true] %s165_s11 }
  0x1b   : > { %p1199_p0 = pnand %p839_p13, %p1161_p3  ;;  %s1203_s29 = scalar_lea.sflag [#allocation3], %s153_s5 }
  0x1c   : > { %s940_s30 = scalar_lea.hbm %s1195_s25, 512  ;;  %s945_s7 = scalar_lea.hbm %s1439_s2, 2048 }
  0x1d   : > { %p941_p1 = scmp.ne.s32.totalorder %s1195_s25, %s940_s30  ;;  %p942_p2 = pneg %p1199_p0 }
  0x1e   : > { %p946_p3 = scmp.lt.u32.totalorder %s1195_s25, %s1439_s2  ;;  %p947_p6 = scmp.lt.u32.totalorder %s945_s7, %s940_s30 }
  0x1f   : > { %p943_p4 = pnand %p942_p2, %p941_p1  ;;  %p949_p10 = scmp.lt.u32.totalorder %s940_s30, %s1195_s25 }
  0x20   : > { %p948_p7 = por %p947_p6, %p946_p3 }
  0x21   : > { %p944_p5 = pneg %p943_p4 }
  0x22   : > { %p950_p11 = por %p949_p10, %p948_p7 }
  0x24   : > { %p951_p13 = pnand %p950_p11, %p944_p5 }
  0x26   : > { %954 = shalt.err (!%p951_p13)
}
  0x27   : > { %s955_s5 = scalar_lea.vmem %s1190_s11, 512  ;;  %s1070_s10 = smov [#allocation2]  }
  0x28   : > { %p956_p1 = scmp.ne.s32.totalorder %s1190_s11, %s955_s5  ;;  %s960_s20 = sshll.u32 %s1070_s10, 4  ;;  %s961_s20 = int_to_ptr.vmem [resolvable:$false] %s960_s20 }
  0x29   : > { %s962_s21 = scalar_lea.vmem %s961_s20, 1024  ;;  %p963_p9 = scmp.lt.s32.totalorder %s1190_s11, %s961_s20 }
  0x2a   : > { %p958_p4 = pnand %p956_p1, %p942_p2  ;;  %p964_p3 = scmp.lt.s32.totalorder %s962_s21, %s955_s5 }
  0x2c   : > { %p959_p12 = pneg %p958_p4  ;;  %p965_p6 = por %p964_p3, %p963_p9 }
  0x2e   : > { %p966_p7 = pnand %p965_p6, %p959_p12 }
  0x30   : > { %969 = shalt.err (!%p966_p7)
}
  0x31   : > { %s1071_s30 = smov 256   ;;  %s1072_s23 = smov 128  }
  0x32   : > { %s1073_s26 = smov 8   ;;  %p818_p2 = scmp.ge.s32.totalorder %s1068_s19, 1 }
  0x33   : > { %834 = dma.hbm_to_vmem [thread:$0]  (!%p1199_p0), %s1195_s25, 512, %s1190_s11, %s1203_s29, %s1071_s30, %s1072_s23, %s1073_s26  }
  0x34   : > { %p173_p5 = scmp.lt.s32.totalorder %s1068_s19, 5 }
  0x36   : > { %p174_p10 = pnand %p818_p2, %p173_p5 }
  0x37   : > { %s1234_s7 = sand.u32 (!%p174_p10), 1, %s1044_s13  }
  0x38   : > { %177 = sbr.rel (%p174_p10) target bundleno = 429 (0x1ad), region = 32  ;;  %s819_s8 = sshll.u32 (!%p174_p10), %s1234_s7, 5 }
  0x39   : > { %s180_s9 = scalar_lea.sflag (!%p174_p10), [#allocation3], %s1234_s7  ;;  %s1238_s5 = scalar_lea.vmem (!%p174_p10), [#allocation2], %s819_s8 }
  0x3f   : > { %1031 = dma.done.wait (%p1169_p8), %s180_s9, 512  }
  0x40   : > { %1033 = vsyncadd (%p1169_p8), %s180_s9, 4294966784  ;;  %v224_v0 = vlaneseq  ;;  %v1074_v1 = vmov 2   ;;  %v1075_v2 = vmov 1966171168   ;;  %v1076_v17 = vmov 0   ;;  %v211_v21 = vld [vmem:[%s1438_s1] sm:$0xff] }
  0x41   : > { %921 = vset.pattern.permute.xlu1 %v1074_v1  ;;  %v222_v3 = vunpack.c.l.s4 %v1075_v2  ;;  %924 = vset.pattern.permute.xlu0 %v1074_v1  ;;  %v821_v8 = vld.sshfl [vmem:[%s1437_s0] sm:$0x33 pattern:$0x75316420]  ;;  %v1077_v18 = vmov 3   ;;  %v1078_v20 = vmov 1   ;;  %v434_v24 = vcombine.high %v211_v21, %v211_v21 }
  0x42   : > { %v225_v4 = vshrl.u32 %v224_v0, 7  ;;  %v220_v10 = vcombine.high %v821_v8, %v821_v8  ;;  %v1079_v23 = vmov 4   ;;  %v206_v44 = vld [vmem:[%s1238_s5] sm:$0xff]  ;;  %v208_v48 = vld [vmem:[%s1238_s5 + $0x10] sm:$0xff]  ;;  %s1080_s29 = smov 126   ;;  %v209_v56 = vld [vmem:[%s1238_s5 + $0x18] sm:$0xff] }
  0x43   : > { %v223_v5 = vunpack.c.0.s8 %v222_v3  ;;  %v207_v62 = vld [vmem:[%s1238_s5 + $0x8] sm:$0xff]  ;;  %s1081_s10 = smov 124   ;;  %s1082_s20 = smov 127   ;;  %vm699_vm0 = vcmask 130048  }
  0x44   : > { %v1248_v7 = vsub.s32 0, %v225_v4  ;;  %s1083_s21 = smov 125   ;;  %s820_s30 = sshll.u32 %s1234_s7, 6 }
  0x45   : > { %v1246_v6 = vsub.s32 %v223_v5, %v225_v4  ;;  %s205_s23 = scalar_lea.vmem [#allocation5], %s820_s30  ;;  %s823_s26 = sshll.u32 %s1056_s16, 4 }
  0x46   : > { %s720_s8 = sadd.s32 %s1052_s15, %s823_s26  ;;  %s723_s9 = sshll.u32 %s205_s23, 4  ;;  %s1377_s9 = int_to_ptr.vmem [resolvable:$true] %s723_s9 }
  0x47   : > { %v227_v9 = vrot.slane %v821_v8, %v1246_v6  ;;  %v234_v12 = vrot.slane %v220_v10, %v1246_v6  ;;  %v441_v22 = vrot.slane %v211_v21, %v1246_v6  ;;  %v448_v28 = vrot.slane %v434_v24, %v1246_v6  ;;  %s824_s5 = sshll.u32 %s720_s8, 7  ;;  %s709_s16 = scalar_lea.sflag [#allocation4], %s1234_s7 }
  0x48   : > { %s1382_s27 = scalar_lea.hbm %s1440_s3, %s824_s5  ;;  %s970_s24 = scalar_lea.vmem %s1377_s9, 1024 }
  0x49   : > { %v240_v11 = vrot.slane %v227_v9, %v1248_v7  ;;  %v235_v13 = vcombine.high %v227_v9, %v227_v9  ;;  %v244_v14 = vrot.slane %v234_v12, %v1248_v7  ;;  %v236_v16 = vcombine.high %v234_v12, %v234_v12  ;;  %p971_p8 = scmp.ne.s32.totalorder %s1377_s9, %s970_s24  ;;  %p1449_p9 = scmp.ne.s32.totalorder %s1446_s28, 0 }
  0x4a   : > { %v449_v25 = vcombine.high %v441_v22, %v441_v22  ;;  %v457_v26 = vrot.slane %v441_v22, %v1246_v6  ;;  %v450_v31 = vcombine.high %v448_v28, %v448_v28  ;;  %v464_v38 = vrot.slane %v448_v28, %v1246_v6  ;;  %s1084_s15 = smov [#allocation5]  }
  0x4b   : > { %314 = vperm.xlu1 %921, %v240_v11   ;;  %v248_v15 = vrot.slane %v235_v13, %v1248_v7  ;;  %318 = vperm.xlu0 %924, %v244_v14   ;;  %v252_v19 = vrot.slane %v236_v16, %v1248_v7  ;;  %p972_p12 = pnand %p971_p8, %p1449_p9 }
  0x4c   : > { %v471_v27 = vrot.slane %v449_v25, %v1246_v6  ;;  %v486_v29 = vrot.slane %v457_v26, %v1248_v7  ;;  %v478_v33 = vrot.slane %v450_v31, %v1246_v6  ;;  %v479_v39 = vcombine.high %v457_v26, %v457_v26 }
  0x4d   : > { %v502_v40 = vrot.slane %v464_v38, %v1248_v7  ;;  %v480_v41 = vcombine.high %v464_v38, %v464_v38  ;;  %p973_p0 = pneg %p972_p12 }
  0x4e   : > { %v481_v30 = vcombine.high %v471_v27, %v471_v27  ;;  %v506_v34 = vrot.slane %v478_v33, %v1248_v7  ;;  %v482_v35 = vcombine.high %v478_v33, %v478_v33  ;;  %v490_v37 = vrot.slane %v471_v27, %v1248_v7 }
  0x4f   : > { %922 = vset.pattern.permute.xlu1 %v1076_v17  ;;  %927 = vset.pattern.permute.xlu0 %v1077_v18  ;;  %v494_v42 = vrot.slane %v479_v39, %v1248_v7  ;;  %v1282_v43 = vrot.slane %v480_v41, %v1248_v7 }
  0x50   : > { %262 = vperm.xlu1 %922, %v248_v15   ;;  %354 = vperm.xlu0 %927, %v240_v11   ;;  %v498_v32 = vrot.slane %v481_v30, %v1248_v7  ;;  %v1274_v36 = vrot.slane %v482_v35, %v1248_v7 }
  0x54   : > { %923 = vset.pattern.permute.xlu1 %v1078_v20  ;;  %366 = vperm.xlu0 %927, %v252_v19  }
  0x55   : > { %278 = vperm.xlu1 %923, %v244_v14  }
  0x58   : > { %930 = vset.pattern.permute.xlu0 %v1079_v23 }
  0x59   : > { %282 = vperm.xlu1 %923, %v248_v15   ;;  %398 = vperm.xlu0 %930, %v244_v14  }
  0x5d   : > { %925 = vset.pattern.permute.xlu1 %v1076_v17  ;;  %931 = vset.pattern.permute.xlu0 %v1076_v17 }
  0x5e   : > { %266 = vperm.xlu1 %925, %v252_v19   ;;  %254 = vperm.xlu0 %931, %v240_v11  }
  0x62   : > { %926 = vset.pattern.permute.xlu1 %v1074_v1  ;;  %258 = vperm.xlu0 %931, %v244_v14  }
  0x63   : > { %322 = vperm.xlu1 %926, %v248_v15  }
  0x66   : > { %516 = vperm.xlu0 %931, %v486_v29  }
  0x67   : > { %326 = vperm.xlu1 %926, %v252_v19  }
  0x6a   : > { %528 = vperm.xlu0 %931, %v498_v32  }
  0x6b   : > { %928 = vset.pattern.permute.xlu1 %v1077_v18 }
  0x6c   : > { %358 = vperm.xlu1 %928, %v244_v14  }
  0x6e   : > { %536 = vperm.xlu0 %931, %v506_v34  }
  0x70   : > { %362 = vperm.xlu1 %928, %v248_v15  }
  0x72   : > { %544 = vperm.xlu0 %931, %v1274_v36  }
  0x74   : > { %929 = vset.pattern.permute.xlu1 %v1079_v23 }
  0x75   : > { %394 = vperm.xlu1 %929, %v240_v11  }
  0x76   : > { %933 = vset.pattern.permute.xlu0 %v1078_v20 }
  0x77   : > { %274 = vperm.xlu0 %933, %v240_v11  }
  0x79   : > { %402 = vperm.xlu1 %929, %v248_v15  }
  0x7b   : > { %286 = vperm.xlu0 %933, %v252_v19  }
  0x7d   : > { %406 = vperm.xlu1 %929, %v252_v19  }
  0x7f   : > { %560 = vperm.xlu0 %933, %v490_v37  }
  0x81   : > { %932 = vset.pattern.permute.xlu1 %v1076_v17 }
  0x82   : > { %520 = vperm.xlu1 %932, %v490_v37  }
  0x83   : > { %572 = vperm.xlu0 %933, %v502_v40  }
  0x86   : > { %524 = vperm.xlu1 %932, %v494_v42  }
  0x87   : > { %580 = vperm.xlu0 %933, %v1282_v43  }
  0x8a   : > { %532 = vperm.xlu1 %932, %v502_v40  }
  0x8b   : > { %935 = vset.pattern.permute.xlu0 %v1074_v1 }
  0x8c   : > { %604 = vperm.xlu0 %935, %v486_v29  }
  0x8e   : > { %540 = vperm.xlu1 %932, %v1282_v43  }
  0x90   : > { %616 = vperm.xlu0 %935, %v498_v32  }
  0x92   : > { %934 = vset.pattern.permute.xlu1 %v1078_v20 }
  0x93   : > { %556 = vperm.xlu1 %934, %v486_v29  }
  0x94   : > { %624 = vperm.xlu0 %935, %v506_v34  }
  0x97   : > { %564 = vperm.xlu1 %934, %v494_v42  }
  0x98   : > { %632 = vperm.xlu0 %935, %v1274_v36  }
  0x9b   : > { %568 = vperm.xlu1 %934, %v498_v32  }
  0x9c   : > { %938 = vset.pattern.permute.xlu0 %v1077_v18 }
  0x9d   : > { %656 = vperm.xlu0 %938, %v490_v37  }
  0x9f   : > { %576 = vperm.xlu1 %934, %v506_v34  }
  0xa1   : > { %668 = vperm.xlu0 %938, %v502_v40  }
  0xa3   : > { %584 = vperm.xlu1 %934, %v1274_v36  }
  0xa7   : > { %936 = vset.pattern.permute.xlu1 %v1074_v1 }
  0xa8   : > { %608 = vperm.xlu1 %936, %v490_v37  }
  0xac   : > { %612 = vperm.xlu1 %936, %v494_v42  }
  0xb0   : > { %620 = vperm.xlu1 %936, %v502_v40  }
  0xb4   : > { %628 = vperm.xlu1 %936, %v1282_v43  }
  0xb8   : > { %937 = vset.pattern.permute.xlu1 %v1077_v18 }
  0xb9   : > { %652 = vperm.xlu1 %937, %v486_v29  }
  0xbd   : > { %660 = vperm.xlu1 %937, %v494_v42  }
  0xc1   : > { %664 = vperm.xlu1 %937, %v498_v32  }
  0xc5   : > { %672 = vperm.xlu1 %937, %v506_v34  }
  0xca   : > { %v315_v45 = vpop.permute.xlu1 %314  ;;  %v319_v47 = vpop.permute.xlu0 %318 }
  0xcb   : > { %v329_v46 = vmul.f32 %v315_v45, %v206_v44  ;;  %v330_v18 = vmul.f32 %v319_v47, %v207_v62 }
  0xcd   : > { %337 = vrot.lane.b32.xlu0 %v329_v46, %s1080_s29 }
  0xcf   : > { %v263_v49 = vpop.permute.xlu1 %262  ;;  %v355_v51 = vpop.permute.xlu0 %354 }
  0xd0   : > { %v1296_v50 = vmul.f32 %v263_v49, %v208_v48  ;;  %v369_v13 = vmul.f32 %v355_v51, %v206_v44 }
  0xd3   : > { %v367_v53 = vpop.permute.xlu0 %366 }
  0xd4   : > { %v279_v52 = vpop.permute.xlu1 %278  ;;  %v372_v25 = vmul.f32 %v367_v53, %v209_v56 }
  0xd5   : > { %v290_v11 = vmul.f32 %v279_v52, %v207_v62 }
  0xd8   : > { %v283_v54 = vpop.permute.xlu1 %282  ;;  %v399_v55 = vpop.permute.xlu0 %398 }
  0xd9   : > { %v291_v16 = vmul.f32 %v283_v54, %v208_v48  ;;  %v410_v26 = vmul.f32 %v399_v55, %v207_v62 }
  0xdd   : > { %v267_v57 = vpop.permute.xlu1 %266  ;;  %v255_v59 = vpop.permute.xlu0 %254 }
  0xde   : > { %v1299_v58 = vmul.f32 %v267_v57, %v209_v56  ;;  %v1301_v60 = vmul.f32 %v255_v59, %v206_v44 }
  0xe1   : > { %v259_v63 = vpop.permute.xlu0 %258 }
  0xe2   : > { %v323_v61 = vpop.permute.xlu1 %322  ;;  %v1304_v0 = vmul.f32 %v259_v63, %v207_v62 }
  0xe3   : > { %v331_v14 = vmul.f32 %v323_v61, %v208_v48 }
  0xe5   : > { %v1306_v2 = vpop.permute.xlu0 %516 }
  0xe6   : > { %v327_v1 = vpop.permute.xlu1 %326 }
  0xe7   : > { %v332_v28 = vmul.f32 %v327_v1, %v209_v56 }
  0xe9   : > { %v1308_v3 = vpop.permute.xlu0 %528 }
  0xeb   : > { %v359_v4 = vpop.permute.xlu1 %358 }
  0xec   : > { %v370_v17 = vmul.f32 %v359_v4, %v207_v62 }
  0xed   : > { %v1310_v5 = vpop.permute.xlu0 %536 }
  0xef   : > { %v363_v6 = vpop.permute.xlu1 %362 }
  0xf0   : > { %v371_v22 = vmul.f32 %v363_v6, %v208_v48 }
  0xf1   : > { %v1312_v7 = vpop.permute.xlu0 %544 }
  0xf4   : > { %v395_v8 = vpop.permute.xlu1 %394 }
  0xf5   : > { %v409_v9 = vmul.f32 %v395_v8, %v206_v44 }
  0xf6   : > { %v275_v10 = vpop.permute.xlu0 %274 }
  0xf7   : > { %417 = vrot.lane.b32.xlu0 %v409_v9, %s1081_s10  ;;  %v289_v12 = vmul.f32 %v275_v10, %v206_v44 }
  0xf8   : > { %v403_v15 = vpop.permute.xlu1 %402 }
  0xf9   : > { %297 = vrot.lane.b32.xlu1 %v289_v12, %s1082_s20  ;;  %v411_v19 = vmul.f32 %v403_v15, %v208_v48 }
  0xfa   : > { %v287_v21 = vpop.permute.xlu0 %286 }
  0xfb   : > { %299 = vrot.lane.b32.xlu0 %v290_v11, %s1082_s20  ;;  %v292_v23 = vmul.f32 %v287_v21, %v209_v56 }
  0xfc   : > { %v407_v20 = vpop.permute.xlu1 %406 }
  0xfd   : > { %377 = vrot.lane.b32.xlu1 %v369_v13, %s1083_s21  ;;  %v412_v29 = vmul.f32 %v407_v20, %v209_v56 }
  0xfe   : > { %v561_v35 = vpop.permute.xlu0 %560 }
  0xff   : > { %341 = vrot.lane.b32.xlu0 %v331_v14, %s1080_s29 }
 0x101   : > { %301 = vrot.lane.b32.xlu1 %v291_v16, %s1082_s20  ;;  %v521_v24 = vpop.permute.xlu1 %520 }
 0x102   : > { %v573_v38 = vpop.permute.xlu0 %572 }
 0x103   : > { %379 = vrot.lane.b32.xlu0 %v370_v17, %s1083_s21 }
 0x105   : > { %339 = vrot.lane.b32.xlu1 %v330_v18, %s1080_s29  ;;  %v525_v27 = vpop.permute.xlu1 %524 }
 0x106   : > { %v1331_v40 = vpop.permute.xlu0 %580 }
 0x107   : > { %421 = vrot.lane.b32.xlu0 %v411_v19, %s1081_s10 }
 0x109   : > { %381 = vrot.lane.b32.xlu1 %v371_v22, %s1083_s21  ;;  %v533_v30 = vpop.permute.xlu1 %532 }
 0x10b   : > { %303 = vrot.lane.b32.xlu0 %v292_v23, %s1082_s20  ;;  %v605_v42 = vpop.permute.xlu0 %604 }
 0x10d   : > { %419 = vrot.lane.b32.xlu1 %v410_v26, %s1081_s10  ;;  %v541_v31 = vpop.permute.xlu1 %540 }
 0x10f   : > { %383 = vrot.lane.b32.xlu0 %v372_v25, %s1083_s21  ;;  %v617_v44 = vpop.permute.xlu0 %616 }
 0x111   : > { %343 = vrot.lane.b32.xlu1 %v332_v28, %s1080_s29  ;;  %s974_s29 = sshll.u32 %s1084_s15, 4  ;;  %s975_s29 = int_to_ptr.vmem [resolvable:$false] %s974_s29 }
 0x112   : > { %v557_v32 = vpop.permute.xlu1 %556  ;;  %p977_p11 = scmp.lt.s32.totalorder %s1377_s9, %s975_s29 }
 0x113   : > { %676 = vperm.xlu0 %938, %v1282_v43  }
 0x115   : > { %423 = vrot.lane.b32.xlu1 %v412_v29, %s1081_s10  ;;  %s976_s10 = scalar_lea.vmem %s975_s29, 2048 }
 0x116   : > { %v1323_v33 = vpop.permute.xlu1 %564  ;;  %p978_p13 = scmp.lt.s32.totalorder %s976_s10, %s970_s24 }
 0x118   : > { %p979_p1 = por %p978_p13, %p977_p11 }
 0x119   : > { %680 = vperm.xlu1 %937, %v1274_v36   ;;  %v625_v36 = vpop.permute.xlu0 %624 }
 0x11a   : > { %v1325_v34 = vpop.permute.xlu1 %568  ;;  %p980_p4 = pnand %p979_p1, %p973_p0 }
 0x11d   : > { %v1333_v47 = vpop.permute.xlu0 %632 }
 0x11e   : > { %v1327_v37 = vpop.permute.xlu1 %576 }
 0x121   : > { %v1337_v49 = vpop.permute.xlu0 %656 }
 0x122   : > { %v1329_v39 = vpop.permute.xlu1 %584 }
 0x125   : > { %v1341_v52 = vpop.permute.xlu0 %668 }
 0x127   : > { %v609_v41 = vpop.permute.xlu1 %608 }
 0x12b   : > { %v613_v43 = vpop.permute.xlu1 %612 }
 0x12f   : > { %v621_v45 = vpop.permute.xlu1 %620 }
 0x133   : > { %v629_v46 = vpop.permute.xlu1 %628 }
 0x138   : > { %v1335_v48 = vpop.permute.xlu1 %652 }
 0x13c   : > { %v1339_v51 = vpop.permute.xlu1 %660 }
 0x13f   : > { %v338_v54 = vpop.permute.xlu0 %337 }
 0x140   : > { %v1343_v53 = vpop.permute.xlu1 %664 }
 0x144   : > { %v1345_v55 = vpop.permute.xlu1 %672 }
 0x169   : > { %v418_v56 = vpop.permute.xlu0 %417 }
 0x16b   : > { %v298_v59 = vpop.permute.xlu1 %297 }
 0x16c   : > { %v309_v61 = vadd.f32 %v298_v59, %v1301_v60 }
 0x16d   : > { %v300_v57 = vpop.permute.xlu0 %299 }
 0x16e   : > { %v349_v1 = vadd.f32 %v338_v54, %v309_v61  ;;  %v310_v12 = vadd.f32 %v300_v57, %v1304_v0 }
 0x16f   : > { %v378_v63 = vpop.permute.xlu1 %377 }
 0x170   : > { %v389_v8 = vadd.f32 %v378_v63, %v349_v1 }
 0x171   : > { %v342_v62 = vpop.permute.xlu0 %341 }
 0x172   : > { %v429_v13 = vadd.f32 %v418_v56, %v389_v8 }
 0x173   : > { %v302_v6 = vpop.permute.xlu1 %301 }
 0x174   : > { %v311_v9 = vadd.f32 %v302_v6, %v1296_v50  ;;  %v547_v60 = vmul.f32 %v1306_v2, %v429_v13  ;;  %v548_v20 = vmul.f32 %v521_v24, %v429_v13  ;;  %v549_v21 = vmul.f32 %v525_v27, %v429_v13 }
 0x175   : > { %v380_v4 = vpop.permute.xlu0 %379  ;;  %v550_v22 = vmul.f32 %v1308_v3, %v429_v13  ;;  %v551_v50 = vmul.f32 %v533_v30, %v429_v13  ;;  %v552_v26 = vmul.f32 %v1310_v5, %v429_v13  ;;  %v553_v28 = vmul.f32 %v541_v31, %v429_v13 }
 0x176   : > { %v351_v14 = vadd.f32 %v342_v62, %v311_v9 }
 0x177   : > { %v340_v11 = vpop.permute.xlu1 %339 }
 0x178   : > { %v350_v15 = vadd.f32 %v340_v11, %v310_v12  ;;  %v554_v11 = vmul.f32 %v1312_v7, %v429_v13 }
 0x179   : > { %v422_v10 = vpop.permute.xlu0 %421 }
 0x17a   : > { %v390_v23 = vadd.f32 %v380_v4, %v350_v15 }
 0x17b   : > { %v382_v16 = vpop.permute.xlu1 %381 }
 0x17c   : > { %v391_v17 = vadd.f32 %v382_v16, %v351_v14 }
 0x17d   : > { %v304_v18 = vpop.permute.xlu0 %303 }
 0x17e   : > { %v431_v19 = vadd.f32 %v422_v10, %v391_v17  ;;  %v312_v0 = vadd.f32 %v304_v18, %v1299_v58 }
 0x17f   : > { %v420_v25 = vpop.permute.xlu1 %419 }
 0x180   : > { %v635_v29 = vmul.f32 %v605_v42, %v431_v19  ;;  %v636_v54 = vmul.f32 %v609_v41, %v431_v19  ;;  %v637_v56 = vmul.f32 %v613_v43, %v431_v19  ;;  %v430_v57 = vadd.f32 %v420_v25, %v390_v23 }
 0x181   : > { %v638_v59 = vmul.f32 %v617_v44, %v431_v19  ;;  %v639_v61 = vmul.f32 %v621_v45, %v431_v19  ;;  %v640_v2 = vmul.f32 %v625_v36, %v431_v19  ;;  %v641_v62 = vmul.f32 %v629_v46, %v431_v19  ;;  %v384_v41 = vpop.permute.xlu0 %383 }
 0x182   : > { %v587_v24 = vmul.f32 %v557_v32, %v430_v57  ;;  %v588_v27 = vmul.f32 %v561_v35, %v430_v57  ;;  %v589_v3 = vmul.f32 %v1323_v33, %v430_v57  ;;  %v590_v63 = vmul.f32 %v1325_v34, %v430_v57 }
 0x183   : > { %v344_v30 = vpop.permute.xlu1 %343  ;;  %v591_v1 = vmul.f32 %v573_v38, %v430_v57  ;;  %v592_v5 = vmul.f32 %v1327_v37, %v430_v57  ;;  %v593_v31 = vmul.f32 %v1331_v40, %v430_v57  ;;  %v594_v10 = vmul.f32 %v1329_v39, %v430_v57 }
 0x184   : > { %v352_v58 = vadd.f32 %v344_v30, %v312_v0  ;;  %v595_v42 = vadd.f32 %v587_v24, %v547_v60  ;;  %v596_v43 = vadd.f32 %v588_v27, %v548_v20  ;;  %v597_v44 = vadd.f32 %v589_v3, %v549_v21 }
 0x185   : > { %v598_v45 = vadd.f32 %v590_v63, %v550_v22  ;;  %v599_v36 = vadd.f32 %v591_v1, %v551_v50  ;;  %v600_v32 = vadd.f32 %v592_v5, %v552_v26  ;;  %v601_v46 = vadd.f32 %v593_v31, %v553_v28 }
 0x186   : > { %v392_v35 = vadd.f32 %v384_v41, %v352_v58  ;;  %v643_v4 = vadd.f32 %v635_v29, %v595_v42  ;;  %v644_v34 = vadd.f32 %v636_v54, %v596_v43  ;;  %v645_v6 = vadd.f32 %v637_v56, %v597_v44 }
 0x187   : > { %v424_v33 = vpop.permute.xlu1 %423  ;;  %v646_v38 = vadd.f32 %v638_v59, %v598_v45  ;;  %v647_v37 = vadd.f32 %v639_v61, %v599_v36  ;;  %v648_v9 = vadd.f32 %v640_v2, %v600_v32  ;;  %v649_v40 = vadd.f32 %v641_v62, %v601_v46 }
 0x188   : > { %v432_v8 = vadd.f32 %v424_v33, %v392_v35  ;;  %v642_v60 = vmul.f32 %v1333_v47, %v431_v19  ;;  %v602_v20 = vadd.f32 %v594_v10, %v554_v11 }
 0x18a   : > { %v683_v12 = vmul.f32 %v1335_v48, %v432_v8  ;;  %v684_v14 = vmul.f32 %v1337_v49, %v432_v8  ;;  %v685_v15 = vmul.f32 %v1339_v51, %v432_v8  ;;  %v686_v16 = vmul.f32 %v1343_v53, %v432_v8 }
 0x18b   : > { %v687_v17 = vmul.f32 %v1341_v52, %v432_v8  ;;  %v688_v18 = vmul.f32 %v1345_v55, %v432_v8  ;;  %v650_v49 = vadd.f32 %v642_v60, %v602_v20 }
 0x18c   : > { %v691_v21 = vadd.f32 %v683_v12, %v643_v4  ;;  %v692_v39 = vadd.f32 %v684_v14, %v644_v34  ;;  %v693_v22 = vadd.f32 %v685_v15, %v645_v6  ;;  %v694_v7 = vadd.f32 %v686_v16, %v646_v38 }
 0x18d   : > { %v695_v48 = vadd.f32 %v687_v17, %v647_v37  ;;  %v696_v13 = vadd.f32 %v688_v18, %v648_v9 }
 0x18e   : > { %700 = vst.msk [vmem:[%s205_s23] sm:$0xff] %vm699_vm0, %v691_v21  ;;  %701 = vst.msk [vmem:[%s205_s23 + $0x8] sm:$0xff] %vm699_vm0, %v692_v39 }
 0x18f   : > { %702 = vst.msk [vmem:[%s205_s23 + $0x10] sm:$0xff] %vm699_vm0, %v693_v22  ;;  %703 = vst.msk [vmem:[%s205_s23 + $0x18] sm:$0xff] %vm699_vm0, %v694_v7 }
 0x190   : > { %704 = vst.msk [vmem:[%s205_s23 + $0x20] sm:$0xff] %vm699_vm0, %v695_v48  ;;  %705 = vst.msk [vmem:[%s205_s23 + $0x28] sm:$0xff] %vm699_vm0, %v696_v13 }
 0x192   : > { %v677_v47 = vpop.permute.xlu0 %676 }
 0x193   : > { %v689_v51 = vmul.f32 %v677_v47, %v432_v8 }
 0x195   : > { %v697_v52 = vadd.f32 %v689_v51, %v649_v40 }
 0x197   : > { %706 = vst.msk [vmem:[%s205_s23 + $0x30] sm:$0xff] %vm699_vm0, %v697_v52 }
 0x198   : > { %v681_v53 = vpop.permute.xlu1 %680 }
 0x199   : > { %v690_v55 = vmul.f32 %v681_v53, %v432_v8 }
 0x19b   : > { %v698_v19 = vadd.f32 %v690_v55, %v650_v49 }
 0x19d   : > { %707 = vst.msk [vmem:[%s205_s23 + $0x38] sm:$0xff] %vm699_vm0, %v698_v19 }
 0x19e   : > { %983 = shalt.err (!%p980_p4)
}
 0x19f   : > { %s984_s20 = scalar_lea.hbm %s1382_s27, 1024  ;;  %s988_s23 = scalar_lea.hbm %s1440_s3, 4096 }
 0x1a0   : > { %p985_p3 = scmp.ne.s32.totalorder %s1382_s27, %s984_s20  ;;  %p989_p2 = scmp.lt.u32.totalorder %s1382_s27, %s1440_s3 }
 0x1a1   : > { %p990_p5 = scmp.lt.u32.totalorder %s988_s23, %s984_s20  ;;  %p992_p8 = scmp.lt.u32.totalorder %s984_s20, %s1382_s27 }
 0x1a2   : > { %p986_p6 = pnand %p985_p3, %p1449_p9 }
 0x1a3   : > { %p991_p10 = por %p990_p5, %p989_p2 }
 0x1a4   : > { %p987_p7 = pneg %p986_p6 }
 0x1a5   : > { %p993_p12 = por %p992_p8, %p991_p10 }
 0x1a7   : > { %p994_p0 = pnand %p993_p12, %p987_p7 }
 0x1a9   : > { %997 = shalt.err (!%p994_p0)
}
 0x1aa   : > { %s1085_s5 = smov 128   ;;  %s1086_s11 = smov 256  }
 0x1ab   : > { %s1087_s25 = smov 8  }
 0x1ac   : > { %829 = dma.vmem_to_hbm [thread:$0]  (%p1449_p9), %s1377_s9, 1024, %s1382_s27, %s709_s16, %s1085_s5, %s1086_s11, %s1087_s25  }
 0x1ad PF: > { %p840_p11 = scmp.ge.s32.totalorder %s1068_s19, 2  ;;  %s738_s24 = sand.u32 1, %s1040_s12  }
 0x1ae   : > { %p1450_p13 = scmp.ne.s32.totalorder %s1447_s4, 0  ;;  %s739_s15 = scalar_lea.sflag [#allocation4], %s738_s24 }
 0x1b0   : > { %p836_p1 = pnand %p840_p11, %p1450_p13 }
 0x1b2   : > { %1035 = dma.done.wait (!%p836_p1), %s739_s15, 1024  }
 0x1b3   : > { %1037 = vsyncadd (!%p836_p1), %s739_s15, 4294966272  ;;  %s19_s19 = sadd.s32 1, %s1068_s19   ;;  %s1451_s28 = sld [smem:[#allocation8_spill]] }
 0x1b4   : > { %p16_p4 = scmp.ge.s32.totalorder %s19_s19, 6   ;;  %s1452_s12 = smov %s1044_s13 }
 0x1b5   : > { %s1453_s13 = smov %s1048_s14  ;;  %s1454_s14 = smov %s1186_s6 }
 0x1b6   : > { %s1455_s15 = smov %s1060_s17  ;;  %s1456_s16 = smov %s1064_s18 }
 0x1b7   : > { %s1457_s17 = smov %s1460_s22  ;;  %18 = sbr.rel (!%p16_p4) target bundleno = 7 (0x7), region = 77 }
 0x1b9   : > { %s1458_s18 = smov %s1451_s28 }
 0x1be   :  { %744 = vsyncpa [#allocation3], 1 }
 0x1bf   :  { %746 = vsyncpa [#allocation3 + $0x1], 1 }
 0x1c0   :  { %747 = vsyncpa [#allocation4], 1 }
 0x1c1   :  { %749 = vsyncpa [#allocation4 + $0x1], 1 }

</bundles_post_ra>
